<compile_context>
chip_gen: v6e
topology: v6e:2x2x1
jax: 0.10.0
libtpu: 0.0.40
codegen_flags: <defaults>
</compile_context>

<pallas_src>
import jax
import jax.numpy as jnp
from jax.experimental import pallas as pl
from jax.experimental.pallas import tpu as pltpu


# VMEM budgeting: keep everything comfortably inside v7x's 64 MiB physical
# VMEM (v5e/v6e have 128 MiB, so this is conservative there).
_VMEM_LIMIT_BYTES = 48 * 1024 * 1024   # scoped-VMEM limit handed to Mosaic
_VMEM_BUDGET_BYTES = 40 * 1024 * 1024  # what our (double-buffered) tiles may use
_MIN_PALLAS_BYTES = 1 << 20            # below this, fused XLA einsum is faster


def _round_up(a, m):
    return ((a + m - 1) // m) * m


# ---------------------------------------------------------------------------
# Path 1 (default): kron formulation — no wrapper transposes at all.
# ---------------------------------------------------------------------------

def make_kron_weight(w_pred, enc_in, dtype=None):
    """K[l*C + c', t*C + c] = W[t, l] * (c' == c); shape (L*C, T*C)."""
    dtype = w_pred.dtype if dtype is None else dtype
    eye = jnp.eye(enc_in, dtype=dtype)
    return jnp.kron(w_pred.T.astype(dtype), eye)          # (L*C, T*C)


def make_kron_bias(b_pred, enc_in):
    """bias_rep[t*C + c] = bias[t], as a (1, T*C) float32 row."""
    return jnp.repeat(b_pred.astype(jnp.float32), enc_in).reshape(1, -1)


def _kron_kernel(x_ref, k_ref, b_ref, o_ref):
    # x_ref: (TM, L*C)  rows of the flattened input (native layout, lane-dense)
    # k_ref: (L*C, T*C) kron(W^T, I_C), resident across all grid steps
    # b_ref: (1, T*C)   bias repeated per channel (f32)
    # o_ref: (TM, T*C)  lane-dense output slab (native layout)
    x = x_ref[...]
    k = k_ref[...]
    if x.dtype != k.dtype:
        # In-kernel cast: x moves through HBM in its own dtype (single pass),
        # but the MXU runs at the (possibly bf16) weight precision.
        x = x.astype(k.dtype)
    acc = jnp.dot(x, k, preferred_element_type=jnp.float32)
    o_ref[...] = (acc + b_ref[...]).astype(o_ref.dtype)


def _pick_kron_tm(B, LC, TC, x_bytes, out_bytes, k_bytes):
    """Pick the batch-row tile (or None if the kron weight can't fit VMEM)."""
    avail = _VMEM_BUDGET_BYTES - 2 * k_bytes - 2 * TC * 4   # weight + bias
    if avail <= 0:
        return None

    def tile_bytes(tm):  # double-buffered input + output tiles
        return 2 * tm * (LC * x_bytes + TC * out_bytes)

    cands = []
    if B <= 1024:
        cands.append(B)                                    # full-B block
    cands += [t for t in (1024, 512, 256, 128, 64, 32, 16, 8) if t < B]
    for tm in cands:
        if (tm == B or tm % 8 == 0) and tile_bytes(tm) <= avail:
            return tm
    return None


def _kron_feasible(LC, TC, k_bytes):
    return _pick_kron_tm(8, LC, TC, 4, 4, k_bytes) is not None


def _kron_forward(x, kron_mat, bias_row, out_dtype):
    B, L, C = x.shape
    LC, TC = kron_mat.shape
    T = TC // C

    x_flat = x.reshape(B, LC)                              # pure reshape: no HBM pass

    tm = _pick_kron_tm(B, LC, TC,
                       x_flat.dtype.itemsize,
                       jnp.dtype(out_dtype).itemsize,
                       kron_mat.size * kron_mat.dtype.itemsize)
    if tm is None:
        raise ValueError("kron weight does not fit the VMEM budget; "
                         "use the transpose path instead")

    # Prefer >=2 grid steps so both v7x TensorCores get work (harmless on
    # single-TC chips; Pallas masks/clamps the partial last block).
    if pl.cdiv(B, tm) == 1 and B >= 16:
        tm = _round_up(B, 16) // 2

    out_flat = pl.pallas_call(
        _kron_kernel,
        out_shape=jax.ShapeDtypeStruct((B, TC), out_dtype),
        grid_spec=pltpu.PrefetchScalarGridSpec(
            num_scalar_prefetch=0,
            grid=(pl.cdiv(B, tm),),
            in_specs=[
                pl.BlockSpec((tm, LC), lambda m: (m, 0)),   # x rows, native layout
                pl.BlockSpec((LC, TC), lambda m: (0, 0)),   # resident kron weight
                pl.BlockSpec((1, TC), lambda m: (0, 0)),    # resident bias row
            ],
            out_specs=pl.BlockSpec((tm, TC), lambda m: (m, 0)),
        ),
        compiler_params=pltpu.CompilerParams(
            dimension_semantics=("parallel",),
            vmem_limit_bytes=_VMEM_LIMIT_BYTES),
    )(x_flat, kron_mat, bias_row)

    return out_flat.reshape(B, T, C)                       # pure reshape


# ---------------------------------------------------------------------------
# Path 2 (fallback for very large L*C x T*C): transpose formulation.
# ---------------------------------------------------------------------------

def _transpose_kernel(x_ref, w_ref, b_ref, o_ref):
    # x_ref: (L, TN) lane-dense slab of the (L, B*C) transposed input
    # w_ref: (T, L)  predict.weight (resident)
    # b_ref: (T, 1)  predict.bias as a column (f32)
    # o_ref: (T, TN) lane-dense output slab
    acc = jnp.dot(w_ref[...], x_ref[...], preferred_element_type=jnp.float32)
    o_ref[...] = (acc + b_ref[...]).astype(o_ref.dtype)


def _pick_transpose_tn(L, T, N_pad, x_bytes, out_bytes, w_bytes):
    avail = _VMEM_BUDGET_BYTES - 2 * w_bytes - 2 * T * 4
    cands = sorted({min(c, N_pad) for c in (2048, 1024, 512, 256, 128)},
                   reverse=True)
    for tn in cands:   # all multiples of 128 (N_pad is)
        if 2 * L * tn * x_bytes + 2 * T * tn * out_bytes <= avail:
            return tn
    return 128


def _transpose_forward(x, w_pred, b_pred, compute_dtype, out_dtype):
    B, L, C = x.shape
    T = w_pred.shape[0]
    N = B * C

    w = w_pred
    if compute_dtype is not None:
        # Cast BEFORE the transpose pass so the materialized (L, B*C) slab
        # (and its read back by the kernel) moves half the bytes.
        x = x.astype(compute_dtype)
        w = w.astype(compute_dtype)

    x2 = jnp.transpose(x, (1, 0, 2)).reshape(L, N)          # (L, B*C)
    N_pad = _round_up(N, 128)                               # pad only to 128
    if N_pad != N:
        x2 = jnp.pad(x2, ((0, 0), (0, N_pad - N)))

    tn = _pick_transpose_tn(L, T, N_pad, x2.dtype.itemsize,
                            jnp.dtype(out_dtype).itemsize,
                            w.size * w.dtype.itemsize)
    # Prefer >=2 grid steps for v7x's two TensorCores when possible.
    if pl.cdiv(N_pad, tn) == 1 and N_pad >= 256:
        tn = _round_up(N_pad // 2, 128)

    b_col = b_pred.reshape(T, 1).astype(jnp.float32)

    out2 = pl.pallas_call(
        _transpose_kernel,
        out_shape=jax.ShapeDtypeStruct((T, N_pad), out_dtype),
        grid_spec=pltpu.PrefetchScalarGridSpec(
            num_scalar_prefetch=0,
            grid=(pl.cdiv(N_pad, tn),),
            in_specs=[
                pl.BlockSpec((L, tn), lambda n: (0, n)),    # lane-dense x slab
                pl.BlockSpec((T, L), lambda n: (0, 0)),     # resident weight
                pl.BlockSpec((T, 1), lambda n: (0, 0)),     # resident bias
            ],
            out_specs=pl.BlockSpec((T, tn), lambda n: (0, n)),
        ),
        compiler_params=pltpu.CompilerParams(
            dimension_semantics=("parallel",),
            vmem_limit_bytes=_VMEM_LIMIT_BYTES),
    )(x2, w, b_col)

    out = out2 if N_pad == N else out2[:, :N]
    out = out.reshape(T, B, C)
    return jnp.transpose(out, (1, 0, 2))                    # (B, T, C)


# ---------------------------------------------------------------------------
# Dispatch + model wrapper
# ---------------------------------------------------------------------------

def predict_forward(x, w_pred, b_pred, *, compute_dtype=None, out_dtype=None,
                    kron_mat=None, bias_row=None, force_path=None,
                    min_pallas_bytes=_MIN_PALLAS_BYTES):
    """out[b, t, c] = sum_l x[b, l, c] * w_pred[t, l] + b_pred[t].

    force_path: None (auto) | "kron" | "transpose" | "xla".
    """
    B, L, C = x.shape
    T = w_pred.shape[0]
    if out_dtype is None:
        out_dtype = x.dtype

    total_bytes = (B * L * C + B * T * C) * jnp.dtype(x.dtype).itemsize
    if force_path == "xla" or (force_path is None and total_bytes < min_pallas_bytes):
        # Tiny problem: pallas_call fixed overhead dominates; let XLA fuse it.
        out = jnp.einsum("blc,tl->btc", x, w_pred) + b_pred[None, :, None]
        return out.astype(out_dtype)

    LC, TC = L * C, T * C
    k_dtype = (kron_mat.dtype if kron_mat is not None
               else (compute_dtype if compute_dtype is not None else w_pred.dtype))
    k_bytes = LC * TC * jnp.dtype(k_dtype).itemsize
    tm = _pick_kron_tm(B, LC, TC, jnp.dtype(x.dtype).itemsize,
                       jnp.dtype(out_dtype).itemsize, k_bytes)

    use_kron = (force_path == "kron") or (force_path is None and tm is not None)
    if use_kron:
        if kron_mat is None:
            kron_mat = make_kron_weight(w_pred, C, dtype=k_dtype)
        if bias_row is None:
            bias_row = make_kron_bias(b_pred, C)
        return _kron_forward(x, kron_mat, bias_row, out_dtype)

    return _transpose_forward(x, w_pred, b_pred, compute_dtype, out_dtype)


class PallasLinearModel:
    """JAX/Pallas port of models/Linear.py::Model (forward only uses `predict`)."""

    def __init__(self, input_len, output_len, enc_in, d_model, c_out, key,
                 compute_dtype=None):
        k1, k2, k3, k4, k5 = jax.random.split(key, 5)

        def lin_w(k, out_f, in_f):
            bound = 1.0 / jnp.sqrt(in_f)
            return jax.random.uniform(k, (out_f, in_f), jnp.float32, -bound, bound)

        # Unused-in-forward parameters (kept for shape parity with the module):
        self.channel_project_w = lin_w(k1, enc_in, enc_in)
        self.channel_project_2_w = lin_w(k2, enc_in, enc_in)
        self.dec_w = lin_w(k3, c_out, d_model)
        self.dec_b = jnp.zeros((c_out,), jnp.float32)
        # Used in forward:
        self.predict_w = lin_w(k4, output_len, input_len)        # (T, L)
        bound = 1.0 / jnp.sqrt(input_len)
        self.predict_b = jax.random.uniform(k5, (output_len,), jnp.float32,
                                            -bound, bound)

        self.enc_in = enc_in
        self.compute_dtype = compute_dtype

        # Precompute kron(W^T, I_C) + repeated bias once (weights are static),
        # so per-call wrappers do zero transposes / pads / weight expansion.
        k_dtype = compute_dtype if compute_dtype is not None else jnp.float32
        LC, TC = input_len * enc_in, output_len * enc_in
        k_bytes = LC * TC * jnp.dtype(k_dtype).itemsize
        if _kron_feasible(LC, TC, k_bytes):
            self.kron_mat = make_kron_weight(self.predict_w, enc_in, dtype=k_dtype)
            self.bias_row = make_kron_bias(self.predict_b, enc_in)
        else:
            self.kron_mat = None
            self.bias_row = None

    def __call__(self, x, x_mark_enc=None, x_dec=None, x_mark_dec=None,
                 force_path=None, min_pallas_bytes=_MIN_PALLAS_BYTES):
        return predict_forward(
            x, self.predict_w, self.predict_b,
            compute_dtype=self.compute_dtype,
            kron_mat=self.kron_mat, bias_row=self.bias_row,
            force_path=force_path, min_pallas_bytes=min_pallas_bytes)


if __name__ == "__main__":
    key = jax.random.PRNGKey(0)
    k_model, k_x = jax.random.split(key)

    B = 2
    input_len = 16     # L
    output_len = 8     # T
    enc_in = 8         # C
    d_model = 32
    c_out = 8

    model = PallasLinearModel(input_len, output_len, enc_in, d_model, c_out, k_model)

    x = jax.random.normal(k_x, (B, input_len, enc_in), jnp.float32)
    # Unused inputs (forward ignores them, matching the PyTorch module)
    x_mark_enc = jnp.zeros((B, input_len, 4), jnp.float32)
    x_dec = jnp.zeros((B, output_len, enc_in), jnp.float32)
    x_mark_dec = jnp.zeros((B, output_len, 4), jnp.float32)

    # Reference (same math as PyTorch forward)
    ref = jnp.einsum("blc,tl->btc", x, model.predict_w) + model.predict_b[None, :, None]

    # 1) kron-formulation Pallas kernel (default path for non-tiny problems)
    out_kron = jax.block_until_ready(
        model(x, x_mark_enc, x_dec, x_mark_dec, force_path="kron"))
    assert out_kron.shape == (B, output_len, enc_in), out_kron.shape
    assert jnp.allclose(out_kron, ref, atol=1e-5, rtol=1e-5)

    # 2) transpose-formulation Pallas kernel (fallback for huge kron weights)
    out_tr = jax.block_until_ready(
        model(x, x_mark_enc, x_dec, x_mark_dec, force_path="transpose"))
    assert out_tr.shape == (B, output_len, enc_in), out_tr.shape
    assert jnp.allclose(out_tr, ref, atol=1e-5, rtol=1e-5)

    # 3) default dispatch (tiny problem -> fused XLA einsum bypass)
    out_def = jax.block_until_ready(model(x, x_mark_enc, x_dec, x_mark_dec))
    assert jnp.allclose(out_def, ref, atol=1e-5, rtol=1e-5)

    print("KERNEL_OK")
</pallas_src>

<mosaic_0001>
module attributes {stable_mosaic.version = 11 : i64} {
  func.func @_kron_kernel(%arg0: i32, %arg1: memref<2x128xf32, #tpu.memory_space<vmem>>, %arg2: memref<128x64xf32, #tpu.memory_space<vmem>>, %arg3: memref<1x64xf32, #tpu.memory_space<vmem>>, %arg4: memref<2x64xf32, #tpu.memory_space<vmem>>) attributes {dimension_semantics = [#tpu.dimension_semantics<parallel>], iteration_bounds = array<i64: 1>, scalar_prefetch = 0 : i64, scratch_operands = 0 : i64, tpu.core_type = #tpu.core_type<tc>, window_params = [{transform_indices = @transform_0, window_bounds = array<i64: 2, 128>}, {pipeline_mode = #tpu.pipeline_mode<synchronous>, transform_indices = @transform_1, window_bounds = array<i64: 128, 64>}, {pipeline_mode = #tpu.pipeline_mode<synchronous>, transform_indices = @transform_2, window_bounds = array<i64: 1, 64>}, {transform_indices = @transform_3, window_bounds = array<i64: 2, 64>}]} {
    %c0 = arith.constant 0 : index
    %c0_0 = arith.constant 0 : index
    %0 = vector.load %arg1[%c0, %c0_0] : memref<2x128xf32, #tpu.memory_space<vmem>>, vector<2x128xf32>
    %c0_1 = arith.constant 0 : index
    %c0_2 = arith.constant 0 : index
    %1 = vector.load %arg2[%c0_1, %c0_2] : memref<128x64xf32, #tpu.memory_space<vmem>>, vector<128x64xf32>
    %cst = arith.constant dense<0.000000e+00> : vector<2x64xf32>
    %2 = tpu.matmul %0, %1, %cst {dimension_numbers = #tpu.dot_dimension_numbers<[1], [0], [0], [1], [0, 0, 1, 1], [], []>} : vector<2x128xf32>, vector<128x64xf32>, vector<2x64xf32> -> vector<2x64xf32>
    %c0_3 = arith.constant 0 : index
    %c0_4 = arith.constant 0 : index
    %3 = vector.load %arg3[%c0_3, %c0_4] : memref<1x64xf32, #tpu.memory_space<vmem>>, vector<1x64xf32>
    %4 = vector.broadcast %3 : vector<1x64xf32> to vector<2x64xf32>
    %5 = arith.addf %2, %4 : vector<2x64xf32>
    %c0_5 = arith.constant 0 : index
    %c0_6 = arith.constant 0 : index
    %6 = vector.load %arg4[%c0_5, %c0_6] : memref<2x64xf32, #tpu.memory_space<vmem>>, vector<2x64xf32>
    tpu.vector_store %arg4[%c0_5, %c0_6], %5 {strides = array<i32>} : memref<2x64xf32, #tpu.memory_space<vmem>>, vector<2x64xf32>,
    return
  }
  func.func @transform_0(%arg0: i32) -> (i32, i32) {
    %c0_i32 = arith.constant 0 : i32
    %c0_i32_0 = arith.constant 0 : i32
    return %arg0, %c0_i32 : i32, i32
  }
  func.func @transform_1(%arg0: i32) -> (i32, i32) {
    %c0_i32 = arith.constant 0 : i32
    %c0_i32_0 = arith.constant 0 : i32
    %c0_i32_1 = arith.constant 0 : i32
    return %c0_i32, %c0_i32_0 : i32, i32
  }
  func.func @transform_2(%arg0: i32) -> (i32, i32) {
    %c0_i32 = arith.constant 0 : i32
    %c0_i32_0 = arith.constant 0 : i32
    %c0_i32_1 = arith.constant 0 : i32
    return %c0_i32, %c0_i32_0 : i32, i32
  }
  func.func @transform_3(%arg0: i32) -> (i32, i32) {
    %c0_i32 = arith.constant 0 : i32
    %c0_i32_0 = arith.constant 0 : i32
    return %arg0, %c0_i32 : i32, i32
  }
}

</mosaic_0001>

<bundles_post_ra>
// kernel: tpu_custom_call.1
= control target key start
LH: loop header
LB: loop body
LE: loop exit
PB: predicated region body
PF: predicated region fallthrough
CT: control target
= control target key end

     0   :  { %v203_v1 = vmov 0.0   ;;  %vm204_vm0 = vmmov 0   ;;  %s283_s0 = inlined_call_operand.vmem [shape: f32[2,128], index: 0, kind: input, shape index: {}]   ;;  %s284_s1 = inlined_call_operand.vmem [shape: f32[128,64], index: 1, kind: input, shape index: {}]   ;;  %s285_s2 = inlined_call_operand.vmem [shape: f32[1,64], index: 2, kind: input, shape index: {}]   ;;  %s286_s3 = inlined_call_operand.hbm [shape: f32[2,64], index: 3, kind: output, shape index: {}]  }
   0x1   :  { %v31_v0 = vld [vmem:[%s284_s1 + $0x78] sm:$0xff]  ;;  %143 = vmatprep.subr.mxu0 %v203_v1  ;;  %v30_v2 = vld [vmem:[%s284_s1 + $0x70] sm:$0xff]  ;;  %175 = vmatprep.mubr.msk.f32.mxu0 %vm204_vm0, %v203_v1  ;;  %v29_v3 = vld [vmem:[%s284_s1 + $0x68] sm:$0xff] }
   0x2   :  { %144 = vmatpush3.msra.mxu0 %v31_v0  ;;  %v28_v4 = vld [vmem:[%s284_s1 + $0x60] sm:$0xff] }
   0x3   :  { %145 = vmatprep.subr.mxu0 %v203_v1 }
   0x4   :  { %146 = vmatpush3.msra.mxu0 %v30_v2 }
   0x5   :  { %147 = vmatprep.subr.mxu0 %v203_v1 }
   0x6   :  { %148 = vmatpush3.msra.mxu0 %v29_v3 }
   0x7   :  { %8 = vsyncpa [#allocation3], 0  ;;  %149 = vmatprep.subr.mxu0 %v203_v1  ;;  %v27_v5 = vld [vmem:[%s284_s1 + $0x58] sm:$0xff]  ;;  %v26_v6 = vld [vmem:[%s284_s1 + $0x50] sm:$0xff]  ;;  %s205_s21 = smov [#allocation2]   ;;  %vm109_vm1 = vcmask 517120  }
   0x8   :  { %150 = vmatpush3.msra.mxu0 %v28_v4  ;;  %v25_v7 = vld [vmem:[%s284_s1 + $0x48] sm:$0xff]  ;;  %v24_v8 = vld [vmem:[%s284_s1 + $0x40] sm:$0xff]  ;;  %v23_v9 = vld [vmem:[%s284_s1 + $0x38] sm:$0xff]  ;;  %s117_s22 = sshll.u32 %s205_s21, 4  ;;  %s118_s22 = int_to_ptr.vmem [resolvable:$true] %s117_s22 }
   0x9   :  { %151 = vmatprep.subr.mxu0 %v203_v1  ;;  %v22_v10 = vld [vmem:[%s284_s1 + $0x30] sm:$0xff]  ;;  %v21_v11 = vld [vmem:[%s284_s1 + $0x28] sm:$0xff]  ;;  %v20_v12 = vld [vmem:[%s284_s1 + $0x20] sm:$0xff]  ;;  %p186_p1 = scmp.lt.s32.totalorder %s118_s22, %s118_s22 }
   0xa   :  { %152 = vmatpush3.msra.mxu0 %v27_v5  ;;  %v19_v13 = vld [vmem:[%s284_s1 + $0x18] sm:$0xff]  ;;  %v18_v14 = vld [vmem:[%s284_s1 + $0x10] sm:$0xff]  ;;  %v17_v15 = vld [vmem:[%s284_s1 + $0x8] sm:$0xff] }
   0xb   :  { %153 = vmatprep.subr.mxu0 %v203_v1  ;;  %v16_v16 = vld [vmem:[%s284_s1] sm:$0xff]  ;;  %s181_s1 = scalar_lea.vmem %s118_s22, 32 }
   0xc   :  { %154 = vmatpush3.msra.mxu0 %v26_v6  ;;  %v15_v17 = vld [vmem:[%s283_s0] sm:$0x3]  ;;  %p182_p0 = scmp.ne.s32.totalorder %s118_s22, %s181_s1  ;;  %p187_p2 = scmp.lt.s32.totalorder %s181_s1, %s181_s1 }
   0xd   :  { %155 = vmatprep.subr.mxu0 %v203_v1  ;;  %v125_v18 = vld [vmem:[%s285_s2] ss:$0 sm:$0xff] }
   0xe   :  { %156 = vmatpush3.msra.mxu0 %v25_v7  ;;  %p188_p3 = por %p187_p2, %p186_p1 }
   0xf   :  { %157 = vmatprep.subr.mxu0 %v203_v1 }
  0x10   :  { %158 = vmatpush3.msra.mxu0 %v24_v8  ;;  %p189_p4 = pnand %p188_p3, %p182_p0 }
  0x11   :  { %159 = vmatprep.subr.mxu0 %v203_v1 }
  0x12   :  { %160 = vmatpush3.msra.mxu0 %v23_v9 }
  0x13   :  { %161 = vmatprep.subr.mxu0 %v203_v1 }
  0x14   :  { %162 = vmatpush3.msra.mxu0 %v22_v10 }
  0x15   :  { %163 = vmatprep.subr.mxu0 %v203_v1 }
  0x16   :  { %164 = vmatpush3.msra.mxu0 %v21_v11 }
  0x17   :  { %165 = vmatprep.subr.mxu0 %v203_v1 }
  0x18   :  { %166 = vmatpush3.msra.mxu0 %v20_v12 }
  0x19   :  { %167 = vmatprep.subr.mxu0 %v203_v1 }
  0x1a   :  { %168 = vmatpush3.msra.mxu0 %v19_v13 }
  0x1b   :  { %169 = vmatprep.subr.mxu0 %v203_v1 }
  0x1c   :  { %170 = vmatpush3.msra.mxu0 %v18_v14 }
  0x1d   :  { %171 = vmatprep.subr.mxu0 %v203_v1 }
  0x1e   :  { %172 = vmatpush3.msra.mxu0 %v17_v15 }
  0x1f   :  { %173 = vmatprep.subr.mxu0 %v203_v1 }
  0x20   :  { %174 = vmatpush3.msra.mxu0 %v16_v16 }
  0x21   :  { %176 = vmatmul.mubr.f32.vlgmr.msra.gmra.mxu0 %v15_v17 }
  0xe1   :  { %v105_v19 = vpop.f32.mrf.mxu0 }
  0xe2   :  { %v106_v20 = vadd.f32 %v125_v18, %v105_v19 }
  0xe3   :  { %v177_v21 = vpop.f32.mrf.mxu0 }
  0xe4   :  { %110 = vst.msk [vmem:[#allocation2] sm:$0x3] %vm109_vm1, %v106_v20 }
  0xe5   :  { %192 = shalt.err (!%p189_p4)
}
  0xe6   :  { %120 = dma.vmem_to_hbm [thread:$0]  %s118_s22, 32, %s286_s3, [#allocation3]  }
  0xe7   :  { %201 = dma.done.wait [#allocation3], 32  }
  0xe8   :  { %202 = vsyncadd [#allocation3], 4294967264 }
  0xe9   :  { %124 = vsyncpa [#allocation3], 1 }

</bundles_post_ra>
